<compile_context>
chip_gen: v5e
topology: v5e:2x2
jax: 0.10.0
libtpu: 0.0.40
codegen_flags: <defaults>
</compile_context>

<pallas_src>
import jax
import jax.numpy as jnp
from jax.experimental import pallas as pl
from jax.experimental.pallas import tpu as pltpu


_LANE = 128     # TPU lane width (last-dim tiling unit)
_SUBLANE = 8    # f32 sublane width (second-to-last-dim tiling unit)


def _round_up(n, m):
    return (n + m - 1) // m * m


def _classifier_kernel(x_ref, w_ref, o_ref):
    # x_ref: [TILE_B, D]   w_ref: [D, O_pad]   o_ref: [TILE_B, O_pad]
    z = jnp.dot(x_ref[...], w_ref[...], preferred_element_type=jnp.float32)
    # Numerically stable sigmoid: exp argument is always <= 0 (no overflow),
    # exp + reciprocal both run on the EUP slot (VALU stays free for filler).
    e = jnp.exp(-jnp.abs(z))
    p = pl.reciprocal(1.0 + e, approx=False)      # sigmoid(|z|); approx=True trades ~1e-4 error for speed
    o_ref[...] = jnp.where(z >= 0.0, p, 1.0 - p).astype(o_ref.dtype)


def classifier_forward(x, w, *, tile_b=None):
    """x: [B, D] float32, w: [D, O] float32 -> [B, O] float32 sigmoid probabilities."""
    B, D = x.shape
    Dw, O = w.shape
    assert D == Dw, f"feature-dim mismatch: x has {D}, w has {Dw}"

    # Pad the output dim to a full lane width so stores are lane-dense.
    o_pad = _round_up(O, _LANE)

    if tile_b is None:
        # VMEM budget (bytes): double-buffered x tile + double-buffered out tile
        # + (conservatively double-counted) resident weight.  24 MiB keeps us well
        # under the default scoped limit and v7x's 64 MiB physical VMEM.
        budget = 24 * 1024 * 1024
        w_bytes = 2 * D * o_pad * 4
        per_row = 2 * (D + o_pad) * 4
        fit = max(budget - w_bytes, 0) // per_row
        fit = max(_SUBLANE, (fit // _SUBLANE) * _SUBLANE)
        tile_b = max(_SUBLANE, min(512, fit, _round_up(B, _SUBLANE)))

    b_pad = _round_up(B, tile_b)

    x_p = x if b_pad == B else jnp.pad(x, ((0, b_pad - B), (0, 0)))
    w_p = w if o_pad == O else jnp.pad(w, ((0, 0), (0, o_pad - O)))

    grid = (b_pad // tile_b,)

    out = pl.pallas_call(
        _classifier_kernel,
        out_shape=jax.ShapeDtypeStruct((b_pad, o_pad), jnp.float32),
        grid_spec=pl.GridSpec(
            grid=grid,
            in_specs=[
                pl.BlockSpec((tile_b, D), lambda i: (i, 0)),   # x: streamed per batch tile
                pl.BlockSpec((D, o_pad), lambda i: (0, 0)),     # w: resident across grid
            ],
            out_specs=pl.BlockSpec((tile_b, o_pad), lambda i: (i, 0)),
        ),
        compiler_params=pltpu.CompilerParams(
            dimension_semantics=("parallel",),   # shard batch tiles across TCs on v7x
        ),
        cost_estimate=pl.CostEstimate(
            flops=2 * b_pad * D * o_pad,
            transcendentals=b_pad * o_pad,
            bytes_accessed=4 * (b_pad * D + D * o_pad + b_pad * o_pad),
        ),
    )(x_p, w_p)

    return out[:B, :O]


def init_classifier_params(key, input_dim, output_dim=1):
    """Deterministic init mimicking nn.Linear default: U(-1/sqrt(D), 1/sqrt(D)).

    PyTorch stores weight as [O, D]; we keep the transposed [D, O] for the kernel.
    """
    bound = 1.0 / (input_dim ** 0.5)
    return jax.random.uniform(
        key, (input_dim, output_dim), dtype=jnp.float32, minval=-bound, maxval=bound
    )


if __name__ == "__main__":
    key = jax.random.PRNGKey(0)
    kx, kw, kx2, kw2 = jax.random.split(key, 4)

    # Primary example: batch=8, input_dim=32, output_dim=1 (matches the module spec).
    B, D, O = 8, 32, 1
    x = jax.random.normal(kx, (B, D), dtype=jnp.float32)
    w = init_classifier_params(kw, D, O)

    out = jax.block_until_ready(classifier_forward(x, w))
    ref = jax.nn.sigmoid(x @ w)
    assert out.shape == (B, O)
    assert jnp.allclose(out, ref, atol=1e-5, rtol=1e-5)

    # Secondary: non-aligned batch and multi-class output exercise the padding paths.
    B2, D2, O2 = 260, 192, 3
    x2 = jax.random.normal(kx2, (B2, D2), dtype=jnp.float32)
    w2 = init_classifier_params(kw2, D2, O2)

    out2 = jax.block_until_ready(classifier_forward(x2, w2))
    ref2 = jax.nn.sigmoid(x2 @ w2)
    assert out2.shape == (B2, O2)
    assert jnp.allclose(out2, ref2, atol=1e-5, rtol=1e-5)

    print("KERNEL_OK")
</pallas_src>

<mosaic_0001>
module attributes {stable_mosaic.version = 11 : i64} {
  func.func @_classifier_kernel(%arg0: i32, %arg1: memref<8x32xf32, #tpu.memory_space<vmem>>, %arg2: memref<32x128xf32, #tpu.memory_space<vmem>>, %arg3: memref<8x128xf32, #tpu.memory_space<vmem>>) attributes {dimension_semantics = [#tpu.dimension_semantics<parallel>], iteration_bounds = array<i64: 1>, scalar_prefetch = 0 : i64, scratch_operands = 0 : i64, tpu.core_type = #tpu.core_type<tc>, window_params = [{transform_indices = @transform_0, window_bounds = array<i64: 8, 32>}, {pipeline_mode = #tpu.pipeline_mode<synchronous>, transform_indices = @transform_1, window_bounds = array<i64: 32, 128>}, {transform_indices = @transform_2, window_bounds = array<i64: 8, 128>}]} {
    %c0 = arith.constant 0 : index
    %c0_0 = arith.constant 0 : index
    %0 = vector.load %arg1[%c0, %c0_0] : memref<8x32xf32, #tpu.memory_space<vmem>>, vector<8x32xf32>
    %c0_1 = arith.constant 0 : index
    %c0_2 = arith.constant 0 : index
    %1 = vector.load %arg2[%c0_1, %c0_2] : memref<32x128xf32, #tpu.memory_space<vmem>>, vector<32x128xf32>
    %cst = arith.constant dense<0.000000e+00> : vector<8x128xf32>
    %2 = tpu.matmul %0, %1, %cst {dimension_numbers = #tpu.dot_dimension_numbers<[1], [0], [0], [1], [0, 0, 1, 1], [], []>} : vector<8x32xf32>, vector<32x128xf32>, vector<8x128xf32> -> vector<8x128xf32>
    %3 = math.absf %2 : vector<8x128xf32>
    %cst_3 = arith.constant 0.000000e+00 : f32
    %4 = vector.broadcast %cst_3 : f32 to vector<8x128xf32>
    %5 = arith.subf %4, %3 : vector<8x128xf32>
    %6 = math.exp %5 : vector<8x128xf32>
    %cst_4 = arith.constant 1.000000e+00 : f32
    %7 = vector.broadcast %cst_4 : f32 to vector<8x128xf32>
    %8 = arith.addf %7, %6 : vector<8x128xf32>
    %9 = tpu.reciprocal %8 : vector<8x128xf32> -> vector<8x128xf32>
    %cst_5 = arith.constant 0.000000e+00 : f32
    %10 = vector.broadcast %cst_5 : f32 to vector<8x128xf32>
    %11 = arith.cmpf oge, %2, %10 : vector<8x128xf32>
    %cst_6 = arith.constant 1.000000e+00 : f32
    %12 = vector.broadcast %cst_6 : f32 to vector<8x128xf32>
    %13 = arith.subf %12, %9 : vector<8x128xf32>
    %14 = arith.select %11, %9, %13 : vector<8x128xi1>, vector<8x128xf32>
    %c0_7 = arith.constant 0 : index
    %c0_8 = arith.constant 0 : index
    %15 = vector.load %arg3[%c0_7, %c0_8] : memref<8x128xf32, #tpu.memory_space<vmem>>, vector<8x128xf32>
    tpu.vector_store %arg3[%c0_7, %c0_8], %14 {strides = array<i32>} : memref<8x128xf32, #tpu.memory_space<vmem>>, vector<8x128xf32>,
    return
  }
  func.func @transform_0(%arg0: i32) -> (i32, i32) {
    %c0_i32 = arith.constant 0 : i32
    %c0_i32_0 = arith.constant 0 : i32
    return %arg0, %c0_i32 : i32, i32
  }
  func.func @transform_1(%arg0: i32) -> (i32, i32) {
    %c0_i32 = arith.constant 0 : i32
    %c0_i32_0 = arith.constant 0 : i32
    %c0_i32_1 = arith.constant 0 : i32
    return %c0_i32, %c0_i32_0 : i32, i32
  }
  func.func @transform_2(%arg0: i32) -> (i32, i32) {
    %c0_i32 = arith.constant 0 : i32
    %c0_i32_0 = arith.constant 0 : i32
    return %arg0, %c0_i32 : i32, i32
  }
}

</mosaic_0001>

<bundles_post_ra>
// kernel: tpu_custom_call.1
= control target key start
LH: loop header
LB: loop body
LE: loop exit
PB: predicated region body
PF: predicated region fallthrough
CT: control target
= control target key end

     0   :  { %7 = vsyncpa [#allocation3], 0  ;;  %s229_s0 = inlined_call_operand.hbm [shape: f32[8,32], index: 0, kind: input, shape index: {}]   ;;  %s230_s1 = inlined_call_operand.hbm [shape: f32[32,128], index: 1, kind: input, shape index: {}]   ;;  %s231_s2 = inlined_call_operand.hbm [shape: f32[8,128], index: 2, kind: output, shape index: {}]  }
   0x1   :  { %8 = vsyncpa [#allocation6], 0 }
   0x2   :  { %9 = vsyncpa [#allocation4], 0  ;;  %s15_s11 = sshll.u32 %s229_s0, 4  ;;  %s200_s12 = smov [#allocation2]   ;;  %s16_s11 = int_to_ptr.hbm [resolvable:$true] %s15_s11 }
   0x3   :  { %s17_s13 = sshll.u32 %s200_s12, 4  ;;  %s25_s16 = sshll.u32 %s230_s1, 4  ;;  %s18_s13 = int_to_ptr.vmem [resolvable:$true] %s17_s13  ;;  %s26_s16 = int_to_ptr.hbm [resolvable:$true] %s25_s16 }
   0x4   :  { %20 = dma.hbm_to_vmem [thread:$0]  %s16_s11, 128, %s18_s13, [#allocation3]  }
   0x5   :  { %s201_s17 = smov [#allocation5]   ;;  %s202_s19 = smov 128  }
   0x6   :  { %s27_s18 = sshll.u32 %s201_s17, 4  ;;  %s203_s20 = smov 8   ;;  %s28_s18 = int_to_ptr.vmem [resolvable:$true] %s27_s18 }
   0x7   :  { %33 = dma.hbm_to_vmem [thread:$0]  %s26_s16, 512, %s28_s18, [#allocation6], %s202_s19, %s202_s19, %s203_s20  }
   0x8   :  { %194 = dma.done.wait [#allocation3], 128  }
   0x9   :  { %195 = vsyncadd [#allocation3], 4294967168 }
   0xa   :  { %196 = dma.done.wait [#allocation6], 512  }
   0xb   :  { %197 = vsyncadd [#allocation6], 4294966784  ;;  %v46_v0 = vld [vmem:[#allocation5 + $0x18] sm:$0xff]  ;;  %v45_v1 = vld [vmem:[#allocation5 + $0x10] sm:$0xff]  ;;  %vm47_vm0 = vcmask 261120   ;;  %s204_s0 = smov [#allocation7]  }
   0xc   :  { %63 = vmatpush.msra.mxu0 %v46_v0  ;;  %v44_v2 = vld [vmem:[#allocation5 + $0x8] sm:$0xff]  ;;  %v43_v3 = vld [vmem:[#allocation5] sm:$0xff]  ;;  %v42_v4 = vld [vmem:[#allocation2] sm:$0xff]  ;;  %s99_s1 = sshll.u32 %s204_s0, 4  ;;  %s101_s23 = sshll.u32 %s231_s2, 4  ;;  %s100_s1 = int_to_ptr.vmem [resolvable:$true] %s99_s1  ;;  %s102_s23 = int_to_ptr.hbm [resolvable:$true] %s101_s23 }
   0xe   :  { %64 = vmatpush.msra.mxu0 %v45_v1 }
  0x10   :  { %65 = vmatpush.msra.mxu0 %v44_v2 }
  0x12   :  { %66 = vmatpush.msra.mxu0 %v43_v3 }
  0x13   :  { %112 = vmatmul.msk.f32.vlgmr.msra.gmra.mxu0 %vm47_vm0, %v42_v4 }
  0x90   :  { %v68_v5 = vpop.f32.mrf.mxu0 }
  0x91   :  { %v71_v6 = vand.u32 2147483647, %v68_v5  ;;  %vm90_vm5 = vcmp.ge.f32.partialorder %v68_v5, 0.0 }
  0x93   :  { %v72_v7 = vsub.f32 0.0, %v71_v6 }
  0x95   :  { %v73_v8 = vmul.f32 1.442695, %v72_v7 }
  0x97   :  { %118 = vpow2.f32 %v73_v8 }
  0x9d   :  { %v119_v9 = vpop.eup %118 }
  0x9e   :  { %v75_v10 = vadd.f32 1.0, %v119_v9 }
  0xa0   :  { %120 = vrcp.f32 %v75_v10  ;;  %v87_v14 = vand.u32 2147483648, %v75_v10  ;;  %v85_v16 = vand.u32 2147483647, %v75_v10  ;;  %vm81_vm2 = vweird.f32 %v75_v10 }
  0xa2   :  { %v88_v18 = vor.u32 1.1754944e-38, %v87_v14  ;;  %vm86_vm4 = vcmp.eq.f32.partialorder %v85_v16, 8.507059e+37 }
  0xa6   :  { %v121_v11 = vpop.eup %120 }
  0xa7   :  { %v77_v12 = vmul.f32 %v121_v11, %v75_v10  ;;  %vm82_vm1 = vweird.f32 %v121_v11 }
  0xa8   :  { %vm83_vm3 = vmor %vm81_vm2, %vm82_vm1 }
  0xa9   :  { %v78_v13 = vsub.f32 1.0, %v77_v12 }
  0xab   :  { %v79_v15 = vmul.f32 %v121_v11, %v78_v13 }
  0xad   :  { %v80_v17 = vadd.f32 %v121_v11, %v79_v15 }
  0xaf   :  { %v84_v19 = vsel %vm83_vm3, %v121_v11, %v80_v17 }
  0xb0   :  { %v89_v20 = vsel %vm86_vm4, %v88_v18, %v84_v19 }
  0xb1   :  { %v91_v21 = vsub.f32 1.0, %v89_v20 }
  0xb3   :  { %v92_v22 = vsel %vm90_vm5, %v89_v20, %v91_v21 }
  0xb4   :  { %93 = vst [vmem:[#allocation7] sm:$0xff] %v92_v22 }
  0xb5   :  { %104 = dma.vmem_to_hbm [thread:$0]  %s100_s1, 128, %s102_s23, [#allocation4]  }
  0xb6   :  { %198 = dma.done.wait [#allocation4], 128  }
  0xb7   :  { %199 = vsyncadd [#allocation4], 4294967168 }
  0xb8   :  { %109 = vsyncpa [#allocation3], 1 }
  0xb9   :  { %110 = vsyncpa [#allocation6], 1 }
  0xba   :  { %111 = vsyncpa [#allocation4], 1 }

</bundles_post_ra>
